<compile_context>
chip_gen: v5e
topology: v5e:2x2
jax: 0.10.0
libtpu: 0.0.40
codegen_flags: <defaults>
</compile_context>

<pallas_src>
import jax
import jax.numpy as jnp
from jax.experimental import pallas as pl
from jax.experimental.pallas import tpu as pltpu


LOG_SCALE_MIN = -20.0
LOG_SCALE_MAX = 2.0


def hierarchy3_forth_kernel(state_ref, goal_ref, w1s_ref, w1g_ref, w2_ref,
                            wh_ref, bias_ref, mean_ref, scale_ref):
    h1 = w1s_ref.shape[1]
    h2 = w2_ref.shape[1]
    two_s = wh_ref.shape[1]
    s_dim = two_s // 2

    # Cast activations to bf16 only at the MXU operands; accumulate in f32.
    s_bf = state_ref[...].astype(jnp.bfloat16)
    g_bf = goal_ref[...].astype(jnp.bfloat16)

    # fc3 layer 1: concat-matmul expressed as two partial matmuls (no host concat).
    h = (jnp.dot(s_bf, w1s_ref[...], preferred_element_type=jnp.float32)
         + jnp.dot(g_bf, w1g_ref[...], preferred_element_type=jnp.float32)
         + bias_ref[0:1, 0:h1])
    h = jnp.maximum(h, 0.0)

    # fc3 layer 2
    h = (jnp.dot(h.astype(jnp.bfloat16), w2_ref[...],
                 preferred_element_type=jnp.float32)
         + bias_ref[1:2, 0:h2])
    h = jnp.maximum(h, 0.0)

    # fused heads: [mean | log_scale] in one matmul
    heads = (jnp.dot(h.astype(jnp.bfloat16), wh_ref[...],
                     preferred_element_type=jnp.float32)
             + bias_ref[2:3, 0:two_s])

    mean_ref[...] = heads[:, 0:s_dim].astype(mean_ref.dtype)
    log_scale = jnp.clip(heads[:, s_dim:two_s], LOG_SCALE_MIN, LOG_SCALE_MAX)
    scale_ref[...] = jnp.exp(log_scale).astype(scale_ref.dtype)


def hierarchy3_forth(state, goal, kparams):
    """state, goal: [B, S] float32. kparams: output of prepare_params()."""
    B, S = state.shape
    w1s, w1g = kparams["w1s"], kparams["w1g"]
    w2, wh, biases = kparams["w2"], kparams["wh"], kparams["biases"]

    # Batch tile: full batch for small B, otherwise 512-row tiles (multiple of 8),
    # sized well under v7x's 32 MiB scoped-VMEM default.
    TB = B if B <= 512 else 512
    grid = (pl.cdiv(B, TB),)

    const2d = lambda i: (0, 0)
    row_spec = pl.BlockSpec((TB, S), lambda i: (i, 0))

    mean, scale = pl.pallas_call(
        hierarchy3_forth_kernel,
        out_shape=(jax.ShapeDtypeStruct((B, S), jnp.float32),
                   jax.ShapeDtypeStruct((B, S), jnp.float32)),
        grid=grid,
        in_specs=[row_spec, row_spec,
                  pl.BlockSpec(w1s.shape, const2d),
                  pl.BlockSpec(w1g.shape, const2d),
                  pl.BlockSpec(w2.shape, const2d),
                  pl.BlockSpec(wh.shape, const2d),
                  pl.BlockSpec(biases.shape, const2d)],
        out_specs=(row_spec, row_spec),
        compiler_params=pltpu.CompilerParams(
            dimension_semantics=("parallel",)),
    )(state, goal, w1s, w1g, w2, wh, biases)
    return mean, scale


def init_params(key, state_dim, hidden_dims):
    """Deterministic init. Weights stored as [in, out] (transposed vs nn.Linear)."""
    dims_in = [2 * state_dim] + hidden_dims[:-1]
    dims_out = hidden_dims
    keys = jax.random.split(key, 2 * (len(hidden_dims) + 2))
    params = {}
    ki = 0

    def linear(kw, kb, fan_in, fan_out):
        bound = 1.0 / jnp.sqrt(fan_in)
        w = jax.random.uniform(kw, (fan_in, fan_out), jnp.float32, -bound, bound)
        b = jax.random.uniform(kb, (1, fan_out), jnp.float32, -bound, bound)
        return w, b

    for i, (din, dout) in enumerate(zip(dims_in, dims_out)):
        w, b = linear(keys[ki], keys[ki + 1], din, dout)
        ki += 2
        params[f"w{i + 1}"] = w
        params[f"b{i + 1}"] = b

    params["wm"], params["bm"] = linear(keys[ki], keys[ki + 1], hidden_dims[-1], state_dim)
    ki += 2
    params["ws"], params["bs"] = linear(keys[ki], keys[ki + 1], hidden_dims[-1], state_dim)
    return params


def prepare_params(params, state_dim):
    """One-time packing for the kernel: bf16 weights, split W1, fused heads,
    all biases packed into one (3, max_width) f32 tile (fewer tiny DMAs)."""
    bf = jnp.bfloat16
    w1, w2 = params["w1"], params["w2"]
    wm, ws = params["wm"], params["ws"]
    h1, h2 = w1.shape[1], w2.shape[1]
    two_s = 2 * state_dim
    maxw = max(h1, h2, two_s)

    biases = jnp.zeros((3, maxw), jnp.float32)
    biases = biases.at[0, :h1].set(params["b1"][0])
    biases = biases.at[1, :h2].set(params["b2"][0])
    biases = biases.at[2, :state_dim].set(params["bm"][0])
    biases = biases.at[2, state_dim:two_s].set(params["bs"][0])

    return {
        "w1s": w1[:state_dim].astype(bf),
        "w1g": w1[state_dim:].astype(bf),
        "w2": w2.astype(bf),
        "wh": jnp.concatenate([wm, ws], axis=1).astype(bf),
        "biases": biases,
    }


def reference(state, goal, params, state_dim):
    """Pure-JAX reference mirroring the kernel's dtype strategy
    (bf16 matmul operands, f32 accumulation and elementwise math)."""
    bf, f32 = jnp.bfloat16, jnp.float32
    w1 = params["w1"].astype(bf)
    h = (jnp.dot(state.astype(bf), w1[:state_dim], preferred_element_type=f32)
         + jnp.dot(goal.astype(bf), w1[state_dim:], preferred_element_type=f32)
         + params["b1"])
    h = jnp.maximum(h, 0.0)
    h = (jnp.dot(h.astype(bf), params["w2"].astype(bf), preferred_element_type=f32)
         + params["b2"])
    h = jnp.maximum(h, 0.0)
    mean = (jnp.dot(h.astype(bf), params["wm"].astype(bf), preferred_element_type=f32)
            + params["bm"])
    log_scale = (jnp.dot(h.astype(bf), params["ws"].astype(bf), preferred_element_type=f32)
                 + params["bs"])
    scale = jnp.exp(jnp.clip(log_scale, LOG_SCALE_MIN, LOG_SCALE_MAX))
    return mean, scale


if __name__ == "__main__":
    STATE_DIM = 16
    HIDDEN_DIMS = [128, 128]   # small version of default [256, 256]
    BATCH = 8

    key = jax.random.PRNGKey(0)
    k_state, k_goal, k_params = jax.random.split(key, 3)

    state = jax.random.normal(k_state, (BATCH, STATE_DIM), jnp.float32)
    goal = jax.random.normal(k_goal, (BATCH, STATE_DIM), jnp.float32)
    params = init_params(k_params, STATE_DIM, HIDDEN_DIMS)
    kparams = prepare_params(params, STATE_DIM)

    mean, scale = hierarchy3_forth(state, goal, kparams)
    mean = jax.block_until_ready(mean)
    scale = jax.block_until_ready(scale)

    mean_ref, scale_ref = reference(state, goal, params, STATE_DIM)
    assert jnp.allclose(mean, mean_ref, atol=2e-3, rtol=2e-3), "mean mismatch"
    assert jnp.allclose(scale, scale_ref, atol=2e-3, rtol=2e-3), "scale mismatch"

    print("KERNEL_OK")
</pallas_src>

<mosaic_0001>
module attributes {stable_mosaic.version = 11 : i64} {
  func.func @hierarchy3_forth_kernel(%arg0: i32, %arg1: memref<8x16xf32, #tpu.memory_space<vmem>>, %arg2: memref<8x16xf32, #tpu.memory_space<vmem>>, %arg3: memref<16x128xbf16, #tpu.memory_space<vmem>>, %arg4: memref<16x128xbf16, #tpu.memory_space<vmem>>, %arg5: memref<128x128xbf16, #tpu.memory_space<vmem>>, %arg6: memref<128x32xbf16, #tpu.memory_space<vmem>>, %arg7: memref<3x128xf32, #tpu.memory_space<vmem>>, %arg8: memref<8x16xf32, #tpu.memory_space<vmem>>, %arg9: memref<8x16xf32, #tpu.memory_space<vmem>>) attributes {dimension_semantics = [#tpu.dimension_semantics<parallel>], iteration_bounds = array<i64: 1>, scalar_prefetch = 0 : i64, scratch_operands = 0 : i64, tpu.core_type = #tpu.core_type<tc>, window_params = [{transform_indices = @transform_0, window_bounds = array<i64: 8, 16>}, {transform_indices = @transform_1, window_bounds = array<i64: 8, 16>}, {pipeline_mode = #tpu.pipeline_mode<synchronous>, transform_indices = @transform_2, window_bounds = array<i64: 16, 128>}, {pipeline_mode = #tpu.pipeline_mode<synchronous>, transform_indices = @transform_3, window_bounds = array<i64: 16, 128>}, {pipeline_mode = #tpu.pipeline_mode<synchronous>, transform_indices = @transform_4, window_bounds = array<i64: 128, 128>}, {pipeline_mode = #tpu.pipeline_mode<synchronous>, transform_indices = @transform_5, window_bounds = array<i64: 128, 32>}, {pipeline_mode = #tpu.pipeline_mode<synchronous>, transform_indices = @transform_6, window_bounds = array<i64: 3, 128>}, {transform_indices = @transform_7, window_bounds = array<i64: 8, 16>}, {transform_indices = @transform_8, window_bounds = array<i64: 8, 16>}]} {
    %c0 = arith.constant 0 : index
    %c0_0 = arith.constant 0 : index
    %0 = vector.load %arg1[%c0, %c0_0] : memref<8x16xf32, #tpu.memory_space<vmem>>, vector<8x16xf32>
    %1 = arith.truncf %0 : vector<8x16xf32> to vector<8x16xbf16>
    %c0_1 = arith.constant 0 : index
    %c0_2 = arith.constant 0 : index
    %2 = vector.load %arg2[%c0_1, %c0_2] : memref<8x16xf32, #tpu.memory_space<vmem>>, vector<8x16xf32>
    %3 = arith.truncf %2 : vector<8x16xf32> to vector<8x16xbf16>
    %c0_3 = arith.constant 0 : index
    %c0_4 = arith.constant 0 : index
    %4 = vector.load %arg3[%c0_3, %c0_4] : memref<16x128xbf16, #tpu.memory_space<vmem>>, vector<16x128xbf16>
    %cst = arith.constant dense<0.000000e+00> : vector<8x128xf32>
    %5 = tpu.matmul %1, %4, %cst {dimension_numbers = #tpu.dot_dimension_numbers<[1], [0], [0], [1], [0, 0, 1, 1], [], []>} : vector<8x16xbf16>, vector<16x128xbf16>, vector<8x128xf32> -> vector<8x128xf32>
    %c0_5 = arith.constant 0 : index
    %c0_6 = arith.constant 0 : index
    %6 = vector.load %arg4[%c0_5, %c0_6] : memref<16x128xbf16, #tpu.memory_space<vmem>>, vector<16x128xbf16>
    %cst_7 = arith.constant dense<0.000000e+00> : vector<8x128xf32>
    %7 = tpu.matmul %3, %6, %cst_7 {dimension_numbers = #tpu.dot_dimension_numbers<[1], [0], [0], [1], [0, 0, 1, 1], [], []>} : vector<8x16xbf16>, vector<16x128xbf16>, vector<8x128xf32> -> vector<8x128xf32>
    %8 = arith.addf %5, %7 : vector<8x128xf32>
    %c0_8 = arith.constant 0 : index
    %c0_9 = arith.constant 0 : index
    %9 = vector.load %arg7[%c0_8, %c0_9] : memref<3x128xf32, #tpu.memory_space<vmem>>, vector<1x128xf32>
    %10 = vector.broadcast %9 : vector<1x128xf32> to vector<8x128xf32>
    %11 = arith.addf %8, %10 : vector<8x128xf32>
    %cst_10 = arith.constant 0.000000e+00 : f32
    %12 = vector.broadcast %cst_10 : f32 to vector<8x128xf32>
    %13 = arith.maximumf %11, %12 : vector<8x128xf32>
    %14 = arith.truncf %13 : vector<8x128xf32> to vector<8x128xbf16>
    %c0_11 = arith.constant 0 : index
    %c0_12 = arith.constant 0 : index
    %15 = vector.load %arg5[%c0_11, %c0_12] : memref<128x128xbf16, #tpu.memory_space<vmem>>, vector<128x128xbf16>
    %cst_13 = arith.constant dense<0.000000e+00> : vector<8x128xf32>
    %16 = tpu.matmul %14, %15, %cst_13 {dimension_numbers = #tpu.dot_dimension_numbers<[1], [0], [0], [1], [0, 0, 1, 1], [], []>} : vector<8x128xbf16>, vector<128x128xbf16>, vector<8x128xf32> -> vector<8x128xf32>
    %c1 = arith.constant 1 : index
    %c0_14 = arith.constant 0 : index
    %17 = vector.load %arg7[%c1, %c0_14] : memref<3x128xf32, #tpu.memory_space<vmem>>, vector<1x128xf32>
    %18 = vector.broadcast %17 : vector<1x128xf32> to vector<8x128xf32>
    %19 = arith.addf %16, %18 : vector<8x128xf32>
    %cst_15 = arith.constant 0.000000e+00 : f32
    %20 = vector.broadcast %cst_15 : f32 to vector<8x128xf32>
    %21 = arith.maximumf %19, %20 : vector<8x128xf32>
    %22 = arith.truncf %21 : vector<8x128xf32> to vector<8x128xbf16>
    %c0_16 = arith.constant 0 : index
    %c0_17 = arith.constant 0 : index
    %23 = vector.load %arg6[%c0_16, %c0_17] : memref<128x32xbf16, #tpu.memory_space<vmem>>, vector<128x32xbf16>
    %cst_18 = arith.constant dense<0.000000e+00> : vector<8x32xf32>
    %24 = tpu.matmul %22, %23, %cst_18 {dimension_numbers = #tpu.dot_dimension_numbers<[1], [0], [0], [1], [0, 0, 1, 1], [], []>} : vector<8x128xbf16>, vector<128x32xbf16>, vector<8x32xf32> -> vector<8x32xf32>
    %c2 = arith.constant 2 : index
    %c0_19 = arith.constant 0 : index
    %25 = vector.load %arg7[%c2, %c0_19] : memref<3x128xf32, #tpu.memory_space<vmem>>, vector<1x32xf32>
    %26 = vector.broadcast %25 : vector<1x32xf32> to vector<8x32xf32>
    %27 = arith.addf %24, %26 : vector<8x32xf32>
    %28 = vector.extract_strided_slice %27 {offsets = [0, 0], sizes = [8, 16], strides = [1, 1]} : vector<8x32xf32> to vector<8x16xf32>
    %c0_20 = arith.constant 0 : index
    %c0_21 = arith.constant 0 : index
    %29 = vector.load %arg8[%c0_20, %c0_21] : memref<8x16xf32, #tpu.memory_space<vmem>>, vector<8x16xf32>
    tpu.vector_store %arg8[%c0_20, %c0_21], %28 {strides = array<i32>} : memref<8x16xf32, #tpu.memory_space<vmem>>, vector<8x16xf32>,
    %30 = vector.extract_strided_slice %27 {offsets = [0, 16], sizes = [8, 16], strides = [1, 1]} : vector<8x32xf32> to vector<8x16xf32>
    %cst_22 = arith.constant -2.000000e+01 : f32
    %cst_23 = arith.constant 2.000000e+00 : f32
    %31 = vector.broadcast %cst_22 : f32 to vector<8x16xf32>
    %32 = arith.maximumf %31, %30 : vector<8x16xf32>
    %33 = vector.broadcast %cst_23 : f32 to vector<8x16xf32>
    %34 = arith.minimumf %33, %32 : vector<8x16xf32>
    %35 = math.exp %34 : vector<8x16xf32>
    %c0_24 = arith.constant 0 : index
    %c0_25 = arith.constant 0 : index
    %36 = vector.load %arg9[%c0_24, %c0_25] : memref<8x16xf32, #tpu.memory_space<vmem>>, vector<8x16xf32>
    tpu.vector_store %arg9[%c0_24, %c0_25], %35 {strides = array<i32>} : memref<8x16xf32, #tpu.memory_space<vmem>>, vector<8x16xf32>,
    return
  }
  func.func @transform_0(%arg0: i32) -> (i32, i32) {
    %c0_i32 = arith.constant 0 : i32
    %c0_i32_0 = arith.constant 0 : i32
    return %arg0, %c0_i32 : i32, i32
  }
  func.func @transform_1(%arg0: i32) -> (i32, i32) {
    %c0_i32 = arith.constant 0 : i32
    %c0_i32_0 = arith.constant 0 : i32
    return %arg0, %c0_i32 : i32, i32
  }
  func.func @transform_2(%arg0: i32) -> (i32, i32) {
    %c0_i32 = arith.constant 0 : i32
    %c0_i32_0 = arith.constant 0 : i32
    %c0_i32_1 = arith.constant 0 : i32
    return %c0_i32, %c0_i32_0 : i32, i32
  }
  func.func @transform_3(%arg0: i32) -> (i32, i32) {
    %c0_i32 = arith.constant 0 : i32
    %c0_i32_0 = arith.constant 0 : i32
    %c0_i32_1 = arith.constant 0 : i32
    return %c0_i32, %c0_i32_0 : i32, i32
  }
  func.func @transform_4(%arg0: i32) -> (i32, i32) {
    %c0_i32 = arith.constant 0 : i32
    %c0_i32_0 = arith.constant 0 : i32
    %c0_i32_1 = arith.constant 0 : i32
    return %c0_i32, %c0_i32_0 : i32, i32
  }
  func.func @transform_5(%arg0: i32) -> (i32, i32) {
    %c0_i32 = arith.constant 0 : i32
    %c0_i32_0 = arith.constant 0 : i32
    %c0_i32_1 = arith.constant 0 : i32
    return %c0_i32, %c0_i32_0 : i32, i32
  }
  func.func @transform_6(%arg0: i32) -> (i32, i32) {
    %c0_i32 = arith.constant 0 : i32
    %c0_i32_0 = arith.constant 0 : i32
    %c0_i32_1 = arith.constant 0 : i32
    return %c0_i32, %c0_i32_0 : i32, i32
  }
  func.func @transform_7(%arg0: i32) -> (i32, i32) {
    %c0_i32 = arith.constant 0 : i32
    %c0_i32_0 = arith.constant 0 : i32
    return %arg0, %c0_i32 : i32, i32
  }
  func.func @transform_8(%arg0: i32) -> (i32, i32) {
    %c0_i32 = arith.constant 0 : i32
    %c0_i32_0 = arith.constant 0 : i32
    return %arg0, %c0_i32 : i32, i32
  }
}

</mosaic_0001>

<bundles_post_ra>
// kernel: tpu_custom_call.1
= control target key start
LH: loop header
LB: loop body
LE: loop exit
PB: predicated region body
PF: predicated region fallthrough
CT: control target
= control target key end

     0   :  { %14 = vsyncpa [#allocation3], 0  ;;  %s664_s0 = inlined_call_operand.vmem [shape: f32[8,16], index: 0, kind: input, shape index: {}]   ;;  %s665_s1 = inlined_call_operand.vmem [shape: f32[8,16], index: 1, kind: input, shape index: {}]   ;;  %s666_s2 = inlined_call_operand.hbm [shape: bf16[16,128], index: 2, kind: input, shape index: {}]   ;;  %s667_s3 = inlined_call_operand.hbm [shape: bf16[16,128], index: 3, kind: input, shape index: {}]   ;;  %s668_s4 = inlined_call_operand.vmem [shape: bf16[128,128], index: 4, kind: input, shape index: {}]   ;;  %s669_s5 = inlined_call_operand.vmem [shape: bf16[128,32], index: 5, kind: input, shape index: {}]   ;;  %s670_s6 = inlined_call_operand.vmem [shape: f32[3,128], index: 6, kind: input, shape index: {}]   ;;  %s671_s7 = inlined_call_operand.hbm [shape: f32[8,16], index: 7, kind: output, shape index: {0}]   ;;  %s672_s8 = inlined_call_operand.hbm [shape: f32[8,16], index: 8, kind: output, shape index: {1}]  }
   0x1   :  { %15 = vsyncpa [#allocation6], 0 }
   0x2   :  { %16 = vsyncpa [#allocation4], 0 }
   0x3   :  { %17 = vsyncpa [#allocation9], 0  ;;  %s26_s29 = sshll.u32 %s666_s2, 4  ;;  %s533_s30 = smov [#allocation2]   ;;  %s27_s29 = int_to_ptr.hbm [resolvable:$true] %s26_s29 }
   0x4   :  { %s28_s9 = sshll.u32 %s533_s30, 4  ;;  %s39_s12 = sshll.u32 %s667_s3, 4  ;;  %s29_s9 = int_to_ptr.vmem [resolvable:$true] %s28_s9  ;;  %s40_s12 = int_to_ptr.hbm [resolvable:$true] %s39_s12 }
   0x5   :  { %s534_s13 = smov 64   ;;  %s535_s14 = smov 4  }
   0x6   :  { %34 = dma.hbm_to_vmem [thread:$0]  %s27_s29, 128, %s29_s9, [#allocation3], %s534_s13, %s534_s13, %s535_s14  }
   0x7   :  { %s536_s15 = smov [#allocation5]  }
   0x8   :  { %s41_s16 = sshll.u32 %s536_s15, 4  ;;  %s42_s16 = int_to_ptr.vmem [resolvable:$true] %s41_s16 }
   0x9   :  { %47 = dma.hbm_to_vmem [thread:$0]  %s40_s12, 128, %s42_s16, [#allocation6], %s534_s13, %s534_s13, %s535_s14  }
   0xa   :  { %525 = dma.done.wait [#allocation3], 128  }
   0xb   :  { %526 = vsyncadd [#allocation3], 4294967168 }
   0xc   :  { %527 = dma.done.wait [#allocation6], 128  }
   0xd   :  { %528 = vsyncadd [#allocation6], 4294967168  ;;  %v400_v0 = vld [vmem:[#allocation5] sm:$0xff]  ;;  %v399_v1 = vld [vmem:[#allocation2] sm:$0xff]  ;;  %vm77_vm0 = vcmask 130048   ;;  %s537_s28 = smov [#allocation7]  }
   0xe   :  { %v65_v2 = vld [vmem:[%s665_s1] sm:$0xff]  ;;  %v408_v5 = vld [vmem:[%s668_s4 + $0x38] sm:$0xff]  ;;  %88 = vmatpush.bf16.msra.mxu0 %v400_v0  ;;  %110 = vmatpush.bf16.msra.mxu1 %v399_v1  ;;  %v407_v7 = vld [vmem:[%s668_s4 + $0x30] sm:$0xff]  ;;  %s296_s29 = sshll.u32 %s537_s28, 4  ;;  %s298_s9 = sshll.u32 %s671_s7, 4  ;;  %s297_s29 = int_to_ptr.vmem [resolvable:$true] %s296_s29  ;;  %s299_s9 = int_to_ptr.hbm [resolvable:$true] %s298_s9 }
   0xf   :  { %v66_v3 = vpack.c.bf16 %v65_v2, %v65_v2  ;;  %v63_v4 = vld [vmem:[%s664_s0] sm:$0xff]  ;;  %187 = vmatpush.bf16.msra.mxu2 %v408_v5  ;;  %v406_v8 = vld [vmem:[%s668_s4 + $0x28] sm:$0xff]  ;;  %v404_v10 = vld [vmem:[%s668_s4 + $0x18] sm:$0xff]  ;;  %s539_s10 = smov [#allocation8]   ;;  %s309_s14 = sshll.u32 %s672_s8, 4  ;;  %s310_s14 = int_to_ptr.hbm [resolvable:$true] %s309_s14 }
  0x10   :  { %v64_v6 = vpack.c.bf16 %v63_v4, %v63_v4  ;;  %v405_v9 = vld [vmem:[%s668_s4 + $0x20] sm:$0xff]  ;;  %v403_v11 = vld [vmem:[%s668_s4 + $0x10] sm:$0xff]  ;;  %v402_v12 = vld [vmem:[%s668_s4 + $0x8] sm:$0xff]  ;;  %s307_s11 = sshll.u32 %s539_s10, 4  ;;  %s308_s11 = int_to_ptr.vmem [resolvable:$true] %s307_s11 }
  0x11   :  { %329 = vmatmul.msk.bf16.vlgmr.msra.gmra.mxu0 %vm77_vm0, %v66_v3  ;;  %v401_v13 = vld [vmem:[%s668_s4] sm:$0xff]  ;;  %v416_v14 = vld [vmem:[%s669_s5 + $0x38] sm:$0xff]  ;;  %v415_v15 = vld [vmem:[%s669_s5 + $0x30] sm:$0xff] }
  0x12   :  { %334 = vmatmul.msk.bf16.vlgmr.msra.gmra.mxu1 %vm77_vm0, %v64_v6  ;;  %268 = vmatpush.bf16.msra.mxu3 %v416_v14  ;;  %v414_v16 = vld [vmem:[%s669_s5 + $0x28] sm:$0xff]  ;;  %v413_v17 = vld [vmem:[%s669_s5 + $0x20] sm:$0xff]  ;;  %v412_v18 = vld [vmem:[%s669_s5 + $0x18] sm:$0xff] }
  0x13   :  { %188 = vmatpush.bf16.msra.mxu2 %v407_v7  ;;  %v411_v19 = vld [vmem:[%s669_s5 + $0x10] sm:$0xff]  ;;  %v424_v20 = vld [vmem:[%s670_s6] ss:$0 sm:$0xff]  ;;  %v410_v29 = vld [vmem:[%s669_s5 + $0x8] sm:$0xff] }
  0x14   :  { %v409_v30 = vld [vmem:[%s669_s5] sm:$0xff] }
  0x15   :  { %v425_v31 = vld [vmem:[%s670_s6 + $0x1] ss:$0 sm:$0xff]  ;;  %v426_v37 = vld [vmem:[%s670_s6 + $0x2] ss:$0 sm:$0xff]  ;;  %s538_s6 = smov 112  }
  0x16   :  { %269 = vmatpush.bf16.msra.mxu3 %v415_v15 }
  0x17   :  { %189 = vmatpush.bf16.msra.mxu2 %v406_v8 }
  0x1a   :  { %270 = vmatpush.bf16.msra.mxu3 %v414_v16 }
  0x1b   :  { %190 = vmatpush.bf16.msra.mxu2 %v405_v9 }
  0x1e   :  { %271 = vmatpush.bf16.msra.mxu3 %v413_v17 }
  0x1f   :  { %191 = vmatpush.bf16.msra.mxu2 %v404_v10 }
  0x22   :  { %272 = vmatpush.bf16.msra.mxu3 %v412_v18 }
  0x23   :  { %192 = vmatpush.bf16.msra.mxu2 %v403_v11 }
  0x26   :  { %273 = vmatpush.bf16.msra.mxu3 %v411_v19 }
  0x27   :  { %193 = vmatpush.bf16.msra.mxu2 %v402_v12 }
  0x2a   :  { %274 = vmatpush.bf16.msra.mxu3 %v410_v29 }
  0x2b   :  { %194 = vmatpush.bf16.msra.mxu2 %v401_v13 }
  0x2e   :  { %275 = vmatpush.bf16.msra.mxu3 %v409_v30 }
  0x8e   :  { %v90_v21 = vpop.f32.mrf.mxu0 }
  0x8f   :  { %v112_v22 = vpop.f32.mrf.mxu1 }
  0x90   :  { %v113_v23 = vadd.f32 %v112_v22, %v90_v21 }
  0x92   :  { %v118_v24 = vadd.f32 %v424_v20, %v113_v23 }
  0x94   :  { %v119_v25 = vmax.f32 %v118_v24, 0.0 }
  0x96   :  { %v120_v26 = vpack.c.bf16 %v119_v25, %v119_v25  ;;  %v92_v27 = vpop.f32.mrf.mxu0 }
  0x97   :  { %v114_v28 = vpop.f32.mrf.mxu1 }
  0x98   :  { %195 = vmatmul.bf16.vlgmr.msra.gmra.mxu2 %v120_v26 }
 0x11b   :  { %v196_v32 = vpop.f32.mrf.mxu2 }
 0x11c   :  { %v197_v33 = vadd.f32 %v425_v31, %v196_v32 }
 0x11e   :  { %v200_v34 = vmax.f32 %v197_v33, 0.0 }
 0x120   :  { %v201_v35 = vpack.c.bf16 %v200_v34, %v200_v34 }
 0x122   :  { %276 = vmatmul.bf16.vlgmr.msra.gmra.mxu3 %v201_v35 }
 0x123   :  { %v198_v36 = vpop.f32.mrf.mxu2 }
 0x1a5   :  { %v277_v38 = vpop.f32.mrf.mxu3 }
 0x1a6   :  { %v278_v39 = vadd.f32 %v426_v37, %v277_v38 }
 0x1a8   :  { %v282_v40 = vmax.f32 %v278_v39, -20.0  ;;  %281 = vst.msk [vmem:[#allocation7] sm:$0xff] %vm77_vm0, %v278_v39 }
 0x1a9   :  { %301 = dma.vmem_to_hbm [thread:$0]  %s297_s29, 128, %s299_s9, [#allocation4]  }
 0x1aa   :  { %v283_v41 = vmin.f32 %v282_v40, 2.0 }
 0x1ac   :  { %v284_v42 = vmul.f32 1.442695, %v283_v41 }
 0x1ad   :  { %v279_v43 = vpop.f32.mrf.mxu3 }
 0x1ae   :  { %427 = vpow2.f32 %v284_v42 }
 0x1b4   :  { %v428_v44 = vpop.eup %427 }
 0x1b5   :  { %287 = vrot.lane.b32.xlu0 %v428_v44, %s538_s6 }
 0x227   :  { %v288_v45 = vpop.permute.xlu0 %287 }
 0x228   :  { %290 = vst.msk [vmem:[#allocation8] sm:$0xff] %vm77_vm0, %v288_v45 }
 0x229   :  { %312 = dma.vmem_to_hbm [thread:$0]  %s308_s11, 128, %s310_s14, [#allocation9]  }
 0x22a   :  { %529 = dma.done.wait [#allocation4], 128  }
 0x22b   :  { %530 = vsyncadd [#allocation4], 4294967168 }
 0x22c   :  { %531 = dma.done.wait [#allocation9], 128  }
 0x22d   :  { %532 = vsyncadd [#allocation9], 4294967168 }
 0x22e   :  { %321 = vsyncpa [#allocation3], 1 }
 0x22f   :  { %322 = vsyncpa [#allocation6], 1 }
 0x230   :  { %323 = vsyncpa [#allocation4], 1 }
 0x231   :  { %324 = vsyncpa [#allocation9], 1 }

</bundles_post_ra>
